<compile_context>
chip_gen: v6e
topology: v6e:2x2x1
jax: 0.10.0
libtpu: 0.0.40
codegen_flags: <defaults>
</compile_context>

<pallas_src>
from typing import NamedTuple, Optional

import jax
import jax.numpy as jnp
from jax.experimental import pallas as pl
from jax.experimental.pallas import tpu as pltpu

_LANE = 128


# ---------------------------------------------------------------------------
# Kernels
# ---------------------------------------------------------------------------
def _distmult_kernel_bf16(e1_ref, rel_ref, w_ref, out_ref):
    # e1_ref, rel_ref: [B, D] f32 (resident)   w_ref: [TN, D] bf16 (streamed)
    # out_ref: [B, TN]
    prod = (e1_ref[...] * rel_ref[...]).astype(w_ref.dtype)            # [B, D]
    # NT-form matmul: contract the last dim of both operands -> no per-step
    # XLU transpose of the streamed (TN, D) weight tile.
    scores = jax.lax.dot_general(
        prod, w_ref[...],
        dimension_numbers=(((1,), (1,)), ((), ())),
        preferred_element_type=jnp.float32)                            # [B, TN]
    out_ref[...] = jax.nn.sigmoid(scores).astype(out_ref.dtype)


def _distmult_kernel_q8(e1_ref, rel_ref, w_ref, scale_ref, out_ref):
    # w_ref: [TN, D] int8 (streamed)   scale_ref: [1, TN] f32 per-entity scale.
    prod = (e1_ref[...] * rel_ref[...]).astype(jnp.bfloat16)           # [B, D]
    # int8 -> bf16 convert is VPU work hidden under the weight-stream DMA;
    # the MXU then takes bf16 x bf16 with f32 accumulation.
    w = w_ref[...].astype(jnp.bfloat16)                                # [TN, D]
    scores = jax.lax.dot_general(
        prod, w,
        dimension_numbers=(((1,), (1,)), ((), ())),
        preferred_element_type=jnp.float32)                            # [B, TN]
    scores = scores * scale_ref[...]           # per-entity dequant (broadcast)
    out_ref[...] = jax.nn.sigmoid(scores).astype(out_ref.dtype)


# ---------------------------------------------------------------------------
# Table preparation (hoisted out of the per-call hot path)
# ---------------------------------------------------------------------------
def _choose_tile_n(N, D, batch, w_itemsize, out_itemsize, tile_n_max):
    """Pick the entity-tile width (lane axis of the output)."""
    n128 = pl.cdiv(N, _LANE) * _LANE              # lane-aligned entity count

    # Double-buffered VMEM footprint per entity column:
    #   weight tile + output tile + scale column (4 B, negligible).
    # Keep it under ~24 MiB: inside the 32 MiB scoped default, comfortable on
    # v7x's 64 MiB physical VMEM (no vmem_limit_bytes override needed).
    budget = 24 * 1024 * 1024
    per_col = 2 * (D * w_itemsize + batch * out_itemsize + 4)
    cap = max(_LANE, (budget // per_col) // _LANE * _LANE)
    cap = min(cap, max(_LANE, (tile_n_max // _LANE) * _LANE))

    if n128 <= cap:
        # Small table.  Split into two lane-aligned tiles when that divides
        # exactly (keeps both v7x TensorCores busy, no padding); otherwise one
        # tile (no padding / no output slice).
        n_lanes = n128 // _LANE
        if n_lanes >= 2 and n_lanes % 2 == 0:
            return n128 // 2
        return n128

    # Large table: prefer a tile that divides the lane-aligned count exactly
    # (no tail padding, no out[:, :N] slice when N % 128 == 0) and yields an
    # even tile count, as long as the tile stays >= cap/2.
    min_tn = max(_LANE, (cap // 2 // _LANE) * _LANE)
    best = None
    for tn in range(cap, min_tn - 1, -_LANE):
        if n128 % tn == 0:
            if (n128 // tn) % 2 == 0:
                return tn
            if best is None:
                best = tn
    if best is not None:
        return best
    # No good divisor: pad the tail, but keep the tile count even.
    n_tiles = pl.cdiv(n128, cap)
    if n_tiles % 2 == 1 and n_tiles > 1:
        n_tiles += 1
    return pl.cdiv(pl.cdiv(n128, n_tiles), _LANE) * _LANE


class PreparedEntityTable(NamedTuple):
    """Entity table pre-cast / pre-quantized and pre-padded for the kernel.

    Build it once (prepare_entity_table) and reuse across calls: re-casting
    the f32 table on every call costs ~3-4x the kernel's own HBM traffic.
    """
    weights: jax.Array             # [n_pad, D] bf16 or int8
    scales: Optional[jax.Array]    # [1, n_pad] f32 (int8 path) or None
    num_entities: int              # true N (pre-padding)
    tile_n: int                    # entity-tile width used by the kernel


def prepare_entity_table(emb_e_weight, *, batch=8, quant="bf16",
                         tile_n_max=16384, out_dtype=jnp.float32):
    """Cast / quantize + pad the [N, D] entity table once, outside the hot path.

    quant="bf16": default, works on every generation.
    quant="int8": per-entity max-abs scale; halves weight HBM bytes again
                  (native int8 MXU on v5e/v6e; fine on v7x via bf16 convert).
    """
    N, D = emb_e_weight.shape
    out_itemsize = jnp.dtype(out_dtype).itemsize
    if quant == "bf16":
        w_itemsize = 2
    elif quant == "int8":
        w_itemsize = 1
    else:
        raise ValueError(f"unsupported quant: {quant!r}")
    # TODO(synk): add an fp8 (e4m3) weight path for v7x; it reuses the same
    # per-entity scale plumbing as the int8 path.

    tn = _choose_tile_n(N, D, batch, w_itemsize, out_itemsize, tile_n_max)
    n_pad = pl.cdiv(N, tn) * tn

    w = emb_e_weight.astype(jnp.float32)
    if quant == "bf16":
        wq = w.astype(jnp.bfloat16)
        scales = None
    else:  # int8 with per-entity (per-row) max-abs scale
        amax = jnp.max(jnp.abs(w), axis=1, keepdims=True)            # [N, 1]
        scale = jnp.where(amax > 0.0, amax / 127.0, 1.0)             # [N, 1]
        wq = jnp.clip(jnp.round(w / scale), -127.0, 127.0).astype(jnp.int8)
        scales = scale[:, 0]                                         # [N]

    if n_pad != N:
        wq = jnp.pad(wq, ((0, n_pad - N), (0, 0)))    # zero rows, sliced off
        if scales is not None:
            scales = jnp.pad(scales, (0, n_pad - N))
    if scales is not None:
        scales = scales.reshape(1, n_pad).astype(jnp.float32)

    return PreparedEntityTable(weights=wq, scales=scales,
                               num_entities=N, tile_n=tn)


# ---------------------------------------------------------------------------
# Forward wrapper
# ---------------------------------------------------------------------------
def distmult_forward(e1_emb, rel_emb, table, *, out_dtype=jnp.float32):
    """sigmoid((e1_emb * rel_emb) @ emb_e.T), tiled over entities.

    `table` is either a PreparedEntityTable (preferred: build once, reuse) or
    the raw [N, D] f32 entity weight (cast + pad then happen per call).
    """
    B, D = e1_emb.shape
    if not isinstance(table, PreparedEntityTable):
        table = prepare_entity_table(table, batch=B, quant="bf16",
                                     out_dtype=out_dtype)

    w = table.weights
    n_pad, D2 = w.shape
    assert D == D2, (D, D2)
    tn = table.tile_n
    n_tiles = n_pad // tn
    N = table.num_entities
    out_itemsize = jnp.dtype(out_dtype).itemsize

    emb_specs = [
        pl.BlockSpec((B, D), lambda j: (0, 0)),       # e1 emb  (VMEM-resident)
        pl.BlockSpec((B, D), lambda j: (0, 0)),       # rel emb (VMEM-resident)
    ]
    # Streamed entity tile.  If xprof ever shows exposed DMA at step
    # boundaries, add pipeline_mode=pl.Buffered(3) here (VMEM headroom exists).
    w_spec = pl.BlockSpec((tn, D), lambda j: (j, 0))

    scale_bytes = 0
    if table.scales is None:
        kernel = _distmult_kernel_bf16
        in_specs = emb_specs + [w_spec]
        args = (e1_emb, rel_emb, w)
    else:
        kernel = _distmult_kernel_q8
        in_specs = emb_specs + [w_spec,
                                pl.BlockSpec((1, tn), lambda j: (0, j))]
        args = (e1_emb, rel_emb, w, table.scales)
        scale_bytes = n_pad * 4

    cost = pl.CostEstimate(
        flops=2 * B * n_pad * D,
        transcendentals=B * n_pad,                    # sigmoid
        bytes_accessed=(n_pad * D * w.dtype.itemsize + scale_bytes
                        + 2 * B * D * e1_emb.dtype.itemsize
                        + B * n_pad * out_itemsize),
    )

    out = pl.pallas_call(
        kernel,
        out_shape=jax.ShapeDtypeStruct((B, n_pad), out_dtype),
        grid_spec=pltpu.PrefetchScalarGridSpec(
            num_scalar_prefetch=0,
            grid=(n_tiles,),
            in_specs=in_specs,
            out_specs=pl.BlockSpec((B, tn), lambda j: (0, j)),
        ),
        compiler_params=pltpu.CompilerParams(
            dimension_semantics=("parallel",),
        ),
        cost_estimate=cost,
    )(*args)

    # Padded columns (sigmoid(0) = 0.5) are sliced off; the tile picker avoids
    # padding whenever N is already a multiple of 128, so this is usually a
    # no-op.
    return out[:, :N] if n_pad != N else out


def xavier_normal(key, shape):
    fan_out, fan_in = shape  # torch Embedding weight is (num_embeddings, dim)
    std = (2.0 / (fan_in + fan_out)) ** 0.5
    return std * jax.random.normal(key, shape, dtype=jnp.float32)


if __name__ == "__main__":
    # Small config consistent with the module's forward.
    num_entities = 256
    num_relations = 32
    embedding_dim = 128
    batch = 8

    key = jax.random.PRNGKey(0)
    k_e, k_r, k_e1, k_rel = jax.random.split(key, 4)

    # Deterministic xavier-normal init; padding_idx=0 -> row 0 zeroed.
    emb_e = xavier_normal(k_e, (num_entities, embedding_dim)).at[0].set(0.0)
    emb_rel = xavier_normal(k_r, (num_relations, embedding_dim)).at[0].set(0.0)

    # Index inputs, shape [B, 1] (as in the original usage, then .squeeze()).
    e1 = jax.random.randint(k_e1, (batch, 1), 0, num_entities, dtype=jnp.int32)
    rel = jax.random.randint(k_rel, (batch, 1), 0, num_relations, dtype=jnp.int32)

    # Glue: embedding lookup + squeeze (dropout is identity in eval mode).
    # TODO(synk): training-mode input dropout and BCELoss are outside the forward kernel.
    e1_embedded = emb_e[e1[:, 0]]      # [B, D]
    rel_embedded = emb_rel[rel[:, 0]]  # [B, D]

    # --- bf16 weight stream (default path, all generations) ------------------
    table_bf16 = prepare_entity_table(emb_e, batch=batch, quant="bf16")
    pred = distmult_forward(e1_embedded, rel_embedded, table_bf16)
    pred = jax.block_until_ready(pred)
    assert pred.shape == (batch, num_entities)

    # Reference with matched bf16 weight precision (f32 accumulation).
    prod_bf16 = (e1_embedded * rel_embedded).astype(jnp.bfloat16)
    ref_bf16 = jax.nn.sigmoid(
        jax.lax.dot_general(prod_bf16, emb_e.astype(jnp.bfloat16),
                            dimension_numbers=(((1,), (1,)), ((), ())),
                            preferred_element_type=jnp.float32))
    assert jnp.allclose(pred, ref_bf16, atol=1e-3, rtol=1e-3)

    # Sanity vs. the full-f32 reference (looser tolerance due to bf16 weights).
    ref_f32 = jax.nn.sigmoid((e1_embedded * rel_embedded) @ emb_e.T)
    assert jnp.allclose(pred, ref_f32, atol=2e-2, rtol=0)

    # --- int8 weight stream (v5e/v6e byte-reduction path) --------------------
    table_q8 = prepare_entity_table(emb_e, batch=batch, quant="int8")
    pred_q8 = distmult_forward(e1_embedded, rel_embedded, table_q8)
    pred_q8 = jax.block_until_ready(pred_q8)
    assert pred_q8.shape == (batch, num_entities)

    # Reference with matched int8-dequant precision.
    wq_bf16 = table_q8.weights[:num_entities].astype(jnp.bfloat16)
    sc = table_q8.scales[0, :num_entities]
    ref_q8 = jax.nn.sigmoid(
        jax.lax.dot_general(prod_bf16, wq_bf16,
                            dimension_numbers=(((1,), (1,)), ((), ())),
                            preferred_element_type=jnp.float32) * sc[None, :])
    assert jnp.allclose(pred_q8, ref_q8, atol=1e-3, rtol=1e-3)
    assert jnp.allclose(pred_q8, ref_f32, atol=5e-2, rtol=0)

    print("KERNEL_OK")
</pallas_src>

<mosaic_0001>
module attributes {stable_mosaic.version = 11 : i64} {
  func.func @_distmult_kernel_bf16(%arg0: i32, %arg1: memref<8x128xf32, #tpu.memory_space<vmem>>, %arg2: memref<8x128xf32, #tpu.memory_space<vmem>>, %arg3: memref<128x128xbf16, #tpu.memory_space<vmem>>, %arg4: memref<8x128xf32, #tpu.memory_space<vmem>>) attributes {dimension_semantics = [#tpu.dimension_semantics<parallel>], iteration_bounds = array<i64: 2>, scalar_prefetch = 0 : i64, scratch_operands = 0 : i64, tpu.core_type = #tpu.core_type<tc>, window_params = [{pipeline_mode = #tpu.pipeline_mode<synchronous>, transform_indices = @transform_0, window_bounds = array<i64: 8, 128>}, {pipeline_mode = #tpu.pipeline_mode<synchronous>, transform_indices = @transform_1, window_bounds = array<i64: 8, 128>}, {transform_indices = @transform_2, window_bounds = array<i64: 128, 128>}, {transform_indices = @transform_3, window_bounds = array<i64: 8, 128>}]} {
    %c0 = arith.constant 0 : index
    %c0_0 = arith.constant 0 : index
    %0 = vector.load %arg1[%c0, %c0_0] : memref<8x128xf32, #tpu.memory_space<vmem>>, vector<8x128xf32>
    %c0_1 = arith.constant 0 : index
    %c0_2 = arith.constant 0 : index
    %1 = vector.load %arg2[%c0_1, %c0_2] : memref<8x128xf32, #tpu.memory_space<vmem>>, vector<8x128xf32>
    %2 = arith.mulf %0, %1 : vector<8x128xf32>
    %3 = arith.truncf %2 : vector<8x128xf32> to vector<8x128xbf16>
    %c0_3 = arith.constant 0 : index
    %c0_4 = arith.constant 0 : index
    %4 = vector.load %arg3[%c0_3, %c0_4] : memref<128x128xbf16, #tpu.memory_space<vmem>>, vector<128x128xbf16>
    %cst = arith.constant dense<0.000000e+00> : vector<8x128xf32>
    %5 = tpu.matmul %3, %4, %cst {dimension_numbers = #tpu.dot_dimension_numbers<[1], [1], [0], [0], [0, 0, 1, 0], [], []>} : vector<8x128xbf16>, vector<128x128xbf16>, vector<8x128xf32> -> vector<8x128xf32>
    %6 = arith.negf %5 : vector<8x128xf32>
    %7 = math.exp %6 : vector<8x128xf32>
    %cst_5 = arith.constant 1.000000e+00 : f32
    %8 = vector.broadcast %cst_5 : f32 to vector<8x128xf32>
    %9 = arith.addf %8, %7 : vector<8x128xf32>
    %10 = arith.divf %8, %9 : vector<8x128xf32>
    %c0_6 = arith.constant 0 : index
    %c0_7 = arith.constant 0 : index
    %11 = vector.load %arg4[%c0_6, %c0_7] : memref<8x128xf32, #tpu.memory_space<vmem>>, vector<8x128xf32>
    tpu.vector_store %arg4[%c0_6, %c0_7], %10 {strides = array<i32>} : memref<8x128xf32, #tpu.memory_space<vmem>>, vector<8x128xf32>,
    return
  }
  func.func @transform_0(%arg0: i32) -> (i32, i32) {
    %c0_i32 = arith.constant 0 : i32
    %c0_i32_0 = arith.constant 0 : i32
    %c0_i32_1 = arith.constant 0 : i32
    return %c0_i32, %c0_i32_0 : i32, i32
  }
  func.func @transform_1(%arg0: i32) -> (i32, i32) {
    %c0_i32 = arith.constant 0 : i32
    %c0_i32_0 = arith.constant 0 : i32
    %c0_i32_1 = arith.constant 0 : i32
    return %c0_i32, %c0_i32_0 : i32, i32
  }
  func.func @transform_2(%arg0: i32) -> (i32, i32) {
    %c0_i32 = arith.constant 0 : i32
    %c0_i32_0 = arith.constant 0 : i32
    return %arg0, %c0_i32 : i32, i32
  }
  func.func @transform_3(%arg0: i32) -> (i32, i32) {
    %c0_i32 = arith.constant 0 : i32
    %c0_i32_0 = arith.constant 0 : i32
    return %c0_i32, %arg0 : i32, i32
  }
}

</mosaic_0001>

<bundles_post_ra>
// kernel: tpu_custom_call.1
= control target key start
LH: loop header
LB: loop body
LE: loop exit
PB: predicated region body
PF: predicated region fallthrough
CT: control target
= control target key end

     0   :  { %8 = vsyncpa [#allocation3], 0  ;;  %s943_s0 = inlined_call_operand.hbm [shape: f32[8,128], index: 0, kind: input, shape index: {}]   ;;  %s944_s1 = inlined_call_operand.hbm [shape: f32[8,128], index: 1, kind: input, shape index: {}]   ;;  %s945_s2 = inlined_call_operand.hbm [shape: bf16[256,128], index: 2, kind: input, shape index: {}]   ;;  %s946_s3 = inlined_call_operand.hbm [shape: f32[8,256], index: 3, kind: output, shape index: {}]  }
   0x1   :  { %9 = vsyncpa [#allocation6], 0 }
   0x2   :  { %10 = vsyncpa [#allocation4], 0 }
   0x3   :  { %12 = vsyncpa [#allocation4 + $0x1], 0  ;;  %s753_s12 = smov 0   ;;  %s755_s13 = smov 0  }
   0x4   :  { %s757_s14 = smov 0   ;;  %s759_s15 = smov 0  }
   0x5 LB: > { %s774_s16 = sadd.s32 4294967295, %s723_s15   ;;  %s432_s17 = sadd.s32 4294967294, %s723_s15   ;;  %s723_s15 = sphi %s759_s15, %s971_s15   ;;  %s719_s14 = sphi %s757_s14, %s970_s14   ;;  %s715_s13 = sphi %s755_s13, %s969_s13   ;;  %s711_s12 = sphi %s753_s12, %s968_s12  }
   0x6   : > { %s778_s18 = sadd.s32 1, %s723_s15   ;;  %s67_s19 = sadd.s32 1, %s719_s14 }
   0x7   : > { %s64_s20 = ssub.s32 %s723_s15, %s778_s18  ;;  %p74_p0 = scmp.ne.s32.totalorder %s719_s14, %s715_s13 }
   0x8   : > { %p65_p1 = scmp.eq.s32.totalorder %s64_s20, 0  ;;  %p75_p2 = scmp.eq.s32.totalorder %s723_s15, 0 }
   0x9   : > { %p80_p3 = scmp.ne.s32.totalorder %s715_s13, %s711_s12  ;;  %p947_p4 = scmp.eq.s32.totalorder %s774_s16, 0 }
   0xa   : > { %s790_s21 = scalar_select %p65_p1, %s719_s14, %s67_s19  }
   0xb   : > { %p792_p5 = por %p75_p2, %p74_p0  ;;  %p798_p6 = por %p947_p4, %p80_p3 }
   0xc   : > { %p104_p7 = scmp.eq.s32.totalorder %s774_s16, 1  ;;  %p110_p8 = scmp.eq.s32.totalorder %s432_s17, 1 }
   0xd   : > { %s952_s23 = scalar_select %p798_p6, 1, 0 }
   0xe   : > { %p433_p9 = scmp.ge.s32.totalorder %s723_s15, 1  ;;  %p117_p10 = scmp.lt.s32.totalorder %s723_s15, 3 }
   0xf   : > { %p805_p11 = por %p104_p7, %p74_p0  ;;  %p809_p12 = por %p110_p8, %p80_p3 }
  0x10   : > { %p813_p13 = pnand %p433_p9, %p117_p10  ;;  %s725_s27 = smov [#allocation2]  }
  0x11   : > { %s953_s24 = scalar_select %p805_p11, 1, 0 }
  0x12   : > { %s954_s25 = scalar_select %p809_p12, 1, 0 }
  0x13   : > { %s955_s26 = scalar_select %p813_p13, 1, 0 }
  0x14   : > { %p500_p2 = pneg %p813_p13  ;;  %s130_s28 = sshll.u32 %s725_s27, 4  ;;  %s131_s28 = int_to_ptr.vmem [resolvable:$true] %s130_s28 }
  0x15   : > { %p517_p4 = scmp.lt.s32.totalorder %s723_s15, 2  ;;  %p956_p0 = scmp.eq.s32.totalorder %s774_s16, 0 }
  0x16   : > { %s726_s4 = smov [#allocation5]   ;;  %s582_s6 = scalar_lea.vmem %s131_s28, 128 }
  0x17   : > { %p823_p7 = pnand %p500_p2, %p956_p0  ;;  %p829_p3 = pnand %p517_p4, %p792_p5 }
  0x18   : > { %s141_s5 = sshll.u32 %s726_s4, 4  ;;  %p583_p9 = scmp.ne.s32.totalorder %s131_s28, %s582_s6  ;;  %s142_s5 = int_to_ptr.vmem [resolvable:$true] %s141_s5 }
  0x19   : > { %p573_p8 = pneg %p823_p7  ;;  %p590_p0 = scmp.lt.s32.totalorder %s131_s28, %s131_s28 }
  0x1a   : > { %p591_p1 = scmp.lt.s32.totalorder %s582_s6, %s582_s6 }
  0x1b   : > { %p585_p10 = pnand %p583_p9, %p573_p8 }
  0x1c   : > { %p592_p12 = por %p591_p1, %p590_p0 }
  0x1d   : > { %p586_p2 = pneg %p585_p10 }
  0x1f   : > { %p593_p11 = pnand %p592_p12, %p586_p2 }
  0x21   : > { %596 = shalt.err (!%p593_p11)
}
  0x22   : > { %503 = dma.hbm_to_vmem [thread:$0]  (!%p823_p7), %s943_s0, 128, %s131_s28, [#allocation3]  }
  0x23   : > { %s152_s9 = sand.u32 1, %s723_s15   ;;  %s608_s10 = scalar_lea.vmem %s142_s5, 128 }
  0x24   : > { %p609_p4 = scmp.ne.s32.totalorder %s142_s5, %s608_s10  ;;  %p616_p10 = scmp.lt.s32.totalorder %s142_s5, %s142_s5 }
  0x25   : > { %p617_p6 = scmp.lt.s32.totalorder %s608_s10, %s608_s10 }
  0x26   : > { %p611_p5 = pnand %p609_p4, %p573_p8 }
  0x27   : > { %p618_p1 = por %p617_p6, %p616_p10 }
  0x28   : > { %p612_p9 = pneg %p611_p5 }
  0x2a   : > { %p619_p12 = pnand %p618_p1, %p612_p9 }
  0x2c   : > { %622 = shalt.err (!%p619_p12)
}
  0x2d   : > { %506 = dma.hbm_to_vmem [thread:$0]  (!%p823_p7), %s944_s1, 128, %s142_s5, [#allocation6]  }
  0x2e   : > { %s154_s19 = sand.u32 1, %s719_s14   ;;  %s458_s22 = sshll.u32 %s723_s15, 10 }
  0x2f   : > { %s437_s20 = sshll.u32 %s154_s19, 6  ;;  %s857_s4 = scalar_lea.hbm %s945_s2, %s458_s22 }
  0x30   : > { %s156_s6 = scalar_lea.vmem [#allocation7], %s437_s20  ;;  %s861_s7 = scalar_lea.sflag [#allocation3], %s152_s9 }
  0x31   : > { %s163_s29 = sshll.u32 %s156_s6, 4  ;;  %s623_s8 = scalar_lea.hbm %s857_s4, 1024  ;;  %s859_s29 = int_to_ptr.vmem [resolvable:$true] %s163_s29 }
  0x32   : > { %p624_p6 = scmp.ne.s32.totalorder %s857_s4, %s623_s8  ;;  %p625_p11 = pneg %p829_p3 }
  0x33   : > { %s628_s11 = scalar_lea.hbm %s945_s2, 2048  ;;  %p629_p2 = scmp.lt.s32.totalorder %s857_s4, %s945_s2 }
  0x34   : > { %p626_p7 = pnand %p625_p11, %p624_p6  ;;  %p630_p0 = scmp.lt.s32.totalorder %s628_s11, %s623_s8 }
  0x36   : > { %p627_p8 = pneg %p626_p7  ;;  %p631_p4 = por %p630_p0, %p629_p2 }
  0x38   : > { %p632_p5 = pnand %p631_p4, %p627_p8 }
  0x3a   : > { %635 = shalt.err (!%p632_p5)
}
  0x3b   : > { %s636_s9 = scalar_lea.vmem %s859_s29, 1024  ;;  %s727_s20 = smov [#allocation7]  }
  0x3c   : > { %p637_p9 = scmp.ne.s32.totalorder %s859_s29, %s636_s9  ;;  %s641_s22 = sshll.u32 %s727_s20, 4  ;;  %s642_s22 = int_to_ptr.vmem [resolvable:$false] %s641_s22 }
  0x3d   : > { %s643_s27 = scalar_lea.vmem %s642_s22, 2048  ;;  %p644_p12 = scmp.lt.s32.totalorder %s859_s29, %s642_s22 }
  0x3e   : > { %p639_p10 = pnand %p637_p9, %p625_p11  ;;  %p645_p6 = scmp.lt.s32.totalorder %s643_s27, %s636_s9 }
  0x40   : > { %p640_p1 = pneg %p639_p10  ;;  %p646_p7 = por %p645_p6, %p644_p12 }
  0x42   : > { %p647_p13 = pnand %p646_p7, %p640_p1 }
  0x44   : > { %650 = shalt.err (!%p647_p13)
}
  0x45   : > { %s728_s28 = smov 64   ;;  %s729_s6 = smov 4  }
  0x46   : > { %510 = dma.hbm_to_vmem [thread:$0]  (!%p829_p3), %s857_s4, 1024, %s859_s29, %s861_s7, %s728_s28, %s728_s28, %s729_s6  }
  0x47   : > { %p959_p11 = scmp.ne.s32.totalorder %s955_s26, 0 }
  0x48   : > { %p960_p8 = scmp.eq.s32.totalorder (!%p959_p11), %s774_s16, 0 }
  0x49   : > { %175 = sbr.rel (%p959_p11) target bundleno = 391 (0x187), region = 32 }
  0x4e   : > { %694 = dma.done.wait (%p960_p8), [#allocation3], 128   ;;  %p961_p2 = pmov %p960_p8 }
  0x50   : > { %696 = vsyncadd (%p961_p2), [#allocation3], 4294967168  ;;  %p962_p0 = pmov %p961_p2 }
  0x52   : > { %698 = dma.done.wait (%p962_p0), [#allocation6], 128   ;;  %p963_p13 = pmov %p962_p0 }
  0x53   : > { %s185_s30 = sand.u32 1, %s774_s16   ;;  %s894_s4 = sand.u32 1, %s715_s13  }
  0x54   : > { %700 = vsyncadd (%p963_p13), [#allocation6], 4294967168  ;;  %s443_s26 = sshll.u32 %s894_s4, 6  ;;  %s186_s29 = scalar_lea.sflag [#allocation3], %s185_s30 }
  0x55   : > { %s189_s7 = scalar_lea.vmem [#allocation7], %s443_s26  ;;  %p964_p3 = scmp.ne.s32.totalorder %s952_s23, 0 }
  0x57   : > { %702 = dma.done.wait (%p964_p3), %s186_s29, 1024  }
  0x58   : > { %704 = vsyncadd (%p964_p3), %s186_s29, 4294966272  ;;  %v730_v0 = vmov 0.0   ;;  %vm731_vm0 = vmmov 0   ;;  %v559_v1 = vld [vmem:[%s189_s7 + $0x38] sm:$0xff]   ;;  %v560_v2 = vld [vmem:[%s189_s7 + $0x30] sm:$0xff]   ;;  %s444_s23 = sshll.u32 %s894_s4, 3 }
  0x59   : > { %468 = vmatprep.subr.bf16.mxu0 %v730_v0  ;;  %484 = vmatprep.mubr.msk.bf16.mxu0 %vm731_vm0, %v730_v0  ;;  %v561_v3 = vld [vmem:[%s189_s7 + $0x28] sm:$0xff]   ;;  %v562_v4 = vld [vmem:[%s189_s7 + $0x20] sm:$0xff]   ;;  %v563_v5 = vld [vmem:[%s189_s7 + $0x18] sm:$0xff]   ;;  %s455_s8 = sshll.u32 %s774_s16, 7  ;;  %s211_s5 = scalar_lea.vmem [#allocation8], %s444_s23 }
  0x5a   : > { %469 = vmatpush3.bf16.xpose.msra.mxu0 %v559_v1  ;;  %v564_v6 = vld [vmem:[%s189_s7 + $0x10] sm:$0xff]   ;;  %v565_v7 = vld [vmem:[%s189_s7 + $0x8] sm:$0xff]   ;;  %v566_v8 = vld [vmem:[%s189_s7] sm:$0xff]   ;;  %s343_s10 = sshll.u32 %s211_s5, 4  ;;  %s906_s19 = scalar_lea.hbm %s946_s3, %s455_s8  ;;  %s344_s10 = int_to_ptr.vmem [resolvable:$true] %s343_s10 }
  0x5b   : > { %470 = vmatprep.subr.bf16.mxu0 %v730_v0  ;;  %v214_v9 = vld [vmem:[#allocation2] sm:$0xff]  ;;  %v215_v10 = vld [vmem:[#allocation5] sm:$0xff]  ;;  %s330_s9 = scalar_lea.sflag [#allocation4], %s894_s4  ;;  %s651_s20 = scalar_lea.vmem %s344_s10, 128 }
  0x5c   : > { %v216_v11 = vmul.f32 %v215_v10, %v214_v9  ;;  %p652_p4 = scmp.ne.s32.totalorder %s344_s10, %s651_s20  ;;  %p965_p5 = scmp.ne.s32.totalorder %s953_s24, 0 }
  0x5d   : > { %s732_s22 = smov [#allocation8]  }
  0x5e   : > { %v217_v12 = vpack.c.bf16 %v216_v11, %v216_v11  ;;  %p653_p9 = pnand %p652_p4, %p965_p5  ;;  %s655_s27 = sshll.u32 %s732_s22, 4  ;;  %s656_s27 = int_to_ptr.vmem [resolvable:$false] %s655_s27 }
  0x5f   : > { %s657_s16 = scalar_lea.vmem %s656_s27, 256  ;;  %p658_p1 = scmp.lt.s32.totalorder %s344_s10, %s656_s27 }
  0x60   : > { %p654_p10 = pneg %p653_p9  ;;  %p659_p12 = scmp.lt.s32.totalorder %s657_s16, %s651_s20 }
  0x62   : > { %471 = vmatpush3.bf16.xpose.msra.mxu0 %v560_v2  ;;  %p660_p6 = por %p659_p12, %p658_p1 }
  0x63   : > { %472 = vmatprep.subr.bf16.mxu0 %v730_v0 }
  0x64   : > { %p661_p7 = pnand %p660_p6, %p654_p10 }
  0x6a   : > { %473 = vmatpush3.bf16.xpose.msra.mxu0 %v561_v3 }
  0x6b   : > { %474 = vmatprep.subr.bf16.mxu0 %v730_v0 }
  0x72   : > { %475 = vmatpush3.bf16.xpose.msra.mxu0 %v562_v4 }
  0x73   : > { %476 = vmatprep.subr.bf16.mxu0 %v730_v0 }
  0x7a   : > { %477 = vmatpush3.bf16.xpose.msra.mxu0 %v563_v5 }
  0x7b   : > { %478 = vmatprep.subr.bf16.mxu0 %v730_v0 }
  0x82   : > { %479 = vmatpush3.bf16.xpose.msra.mxu0 %v564_v6 }
  0x83   : > { %480 = vmatprep.subr.bf16.mxu0 %v730_v0 }
  0x8a   : > { %481 = vmatpush3.bf16.xpose.msra.mxu0 %v565_v7 }
  0x8b   : > { %482 = vmatprep.subr.bf16.mxu0 %v730_v0 }
  0x92   : > { %483 = vmatpush3.bf16.xpose.msra.mxu0 %v566_v8 }
  0x99   : > { %485 = vmatmul.mubr.bf16.vlgmr.msra.gmra.mxu0 %v217_v12 }
 0x159   : > { %v316_v13 = vpop.f32.mrf.mxu0 }
 0x15a   : > { %v453_v14 = vmul.f32 -1.442695, %v316_v13 }
 0x15b   : > { %v486_v15 = vpop.f32.mrf.mxu0 }
 0x15c   : > { %567 = vpow2.f32 %v453_v14 }
 0x15d   : > { %v319_v16 = vpop.f32.mrf.mxu0 }
 0x15f   : > { %v487_v17 = vpop.f32.mrf.mxu0 }
 0x169   : > { %v568_v18 = vpop.eup %567 }
 0x16a   : > { %v325_v19 = vadd.f32 1.0, %v568_v18 }
 0x16c   : > { %569 = vrcp.f32 %v325_v19 }
 0x179   : > { %v570_v20 = vpop.eup %569 }
 0x17a   : > { %328 = vst [vmem:[%s211_s5] sm:$0xff] %v570_v20 }
 0x17b   : > { %664 = shalt.err (!%p661_p7)
}
 0x17c   : > { %s665_s28 = scalar_lea.hbm %s906_s19, 128  ;;  %s669_s4 = scalar_lea.hbm %s946_s3, 256 }
 0x17d   : > { %p666_p11 = scmp.ne.s32.totalorder %s906_s19, %s665_s28  ;;  %p670_p0 = scmp.lt.s32.totalorder %s906_s19, %s946_s3 }
 0x17e   : > { %p671_p13 = scmp.lt.s32.totalorder %s669_s4, %s665_s28 }
 0x17f   : > { %p667_p8 = pnand %p666_p11, %p965_p5 }
 0x180   : > { %p672_p3 = por %p671_p13, %p670_p0 }
 0x181   : > { %p668_p2 = pneg %p667_p8 }
 0x183   : > { %p673_p4 = pnand %p672_p3, %p668_p2 }
 0x185   : > { %676 = shalt.err (!%p673_p4)
}
 0x186   : > { %498 = dma.vmem_to_hbm [thread:$0]  (%p965_p5), %s344_s10, 128, %s906_s19, %s330_s9  }
 0x187 PF: > { %s355_s7 = sand.u32 1, %s711_s12   ;;  %p966_p9 = scmp.ne.s32.totalorder %s954_s25, 0 }
 0x188   : > { %p967_p10 = scmp.ge.s32.totalorder %s723_s15, 2  ;;  %s356_s23 = scalar_lea.sflag [#allocation4], %s355_s7 }
 0x18a   : > { %p512_p1 = pnand %p967_p10, %p966_p9 }
 0x18c   : > { %p513_p12 = pneg %p512_p1 }
 0x18e   : > { %706 = dma.done.wait (%p513_p12), %s356_s23, 128  }
 0x18f   : > { %708 = vsyncadd (%p513_p12), %s356_s23, 4294967168  ;;  %p15_p6 = scmp.ge.s32.totalorder %s778_s18, 4   ;;  %s968_s12 = smov %s715_s13 }
 0x190   : > { %s969_s13 = smov %s719_s14  ;;  %s970_s14 = smov %s790_s21 }
 0x191   : > { %s971_s15 = smov %s778_s18  ;;  %17 = sbr.rel (!%p15_p6) target bundleno = 5 (0x5), region = 84 }
 0x196   :  { %361 = vsyncpa [#allocation3], 1 }
 0x197   :  { %363 = vsyncpa [#allocation3 + $0x1], 1 }
 0x198   :  { %364 = vsyncpa [#allocation6], 1 }
 0x199   :  { %365 = vsyncpa [#allocation4], 1 }
 0x19a   :  { %367 = vsyncpa [#allocation4 + $0x1], 1 }

</bundles_post_ra>
